<compile_context>
chip_gen: v7x
topology: tpu7x:2x2x1
jax: 0.10.0
libtpu: 0.0.40
codegen_flags: <defaults>
</compile_context>

<pallas_src>
import functools

import jax
import jax.numpy as jnp
from jax.experimental import pallas as pl
from jax.experimental.pallas import tpu as pltpu


def _round_up(x, m):
    return -(-x // m) * m


def _label_smoothing_kernel(x_ref, tgt_ref, out_ref, *,
                            confidence, smoothing, num_classes,
                            row_tile, total_rows):
    """Emit one partial loss-sum per grid step (rows tiled along the grid)."""
    x = x_ref[...].astype(jnp.float32)                        # (TN, C) f32 compute
    m = jnp.max(x, axis=-1, keepdims=True)                    # (TN, 1)
    xm = x - m                                                # shared by both sums

    # loss_row = lse - sum(w * x)   with w = conf*onehot + smoothing/C, sum(w)=1
    #          = log(sum(exp(x - m))) - sum(w * (x - m))
    se = jnp.sum(jnp.exp(xm), axis=-1, keepdims=True)         # (TN, 1)

    base = smoothing / num_classes
    ids = jax.lax.broadcasted_iota(jnp.int32, x.shape, 1)     # (TN, C)
    w = jnp.where(ids == tgt_ref[...], confidence + base, base)
    wsum = jnp.sum(w * xm, axis=-1, keepdims=True)            # (TN, 1)

    loss = jnp.log(se) - wsum                                 # (TN, 1)

    if total_rows % row_tile != 0:
        # Ragged last tile: out-of-range rows hold unspecified data -> zero
        # their contribution (cheap: mask is only (TN, 1) wide).
        i = pl.program_id(0)
        row_ids = i * row_tile + jax.lax.broadcasted_iota(jnp.int32, loss.shape, 0)
        loss = jnp.where(row_ids < total_rows, loss, 0.0)

    out_ref[0, 0] = jnp.sum(loss)


def label_smoothing_loss(x, target, smoothing=0.1, *,
                         row_tile=None, max_row_tile=4096):
    """x: [N, C] logits (f32 or bf16), target: [N] int class indices.

    Returns the scalar label-smoothed NLL loss (f32), matching the PyTorch
    LabelSmoothing module's forward.
    """
    N, C = x.shape
    confidence = 1.0 - smoothing
    itemsize = jnp.dtype(x.dtype).itemsize
    sublane = max(8, 32 // itemsize)          # f32 -> 8, bf16 -> 16, int8/fp8 -> 32

    try:
        vmem_cap = int(pltpu.get_tpu_info().vmem_capacity_bytes)
    except Exception:
        vmem_cap = 64 << 20                   # v7x-safe fallback

    # Per-row VMEM footprint: double-buffered x tile + ~3 f32 in-kernel
    # intermediates (x_f32 / exp / w*x) + lane-padded (TN,1) target tile (x2).
    bytes_per_row = 2 * C * itemsize + 3 * C * 4 + 2 * 128 * 4

    if row_tile is None:
        budget = int(vmem_cap * 0.6)
        rt = budget // bytes_per_row
        rt = max(sublane, min(max_row_tile, (rt // sublane) * sublane))
        rt = min(rt, _round_up(N, sublane))   # don't over-size for tiny batches
        row_tile = int(rt)
    assert row_tile % sublane == 0 and row_tile >= sublane

    num_tiles = pl.cdiv(N, row_tile)
    tgt2d = target.astype(jnp.int32).reshape(N, 1)

    kernel = functools.partial(
        _label_smoothing_kernel,
        confidence=confidence, smoothing=smoothing, num_classes=C,
        row_tile=row_tile, total_rows=N)

    vmem_needed = row_tile * bytes_per_row + (2 << 20)
    vmem_limit = int(max(min(vmem_needed, vmem_cap - (8 << 20)), 32 << 20))

    partials = pl.pallas_call(
        kernel,
        out_shape=jax.ShapeDtypeStruct((num_tiles, 1), jnp.float32),
        grid_spec=pltpu.PrefetchScalarGridSpec(
            num_scalar_prefetch=0,
            grid=(num_tiles,),
            in_specs=[
                pl.BlockSpec((row_tile, C), lambda i: (i, 0)),
                pl.BlockSpec((row_tile, 1), lambda i: (i, 0)),
            ],
            out_specs=pl.BlockSpec((1, 1), lambda i: (i, 0),
                                   memory_space=pltpu.MemorySpace.SMEM),
        ),
        compiler_params=pltpu.CompilerParams(
            # TODO(synk): on v7x, pltpu.CORE_PARALLEL here shards the row axis
            # across both TensorCores; kept "parallel" for cross-chip safety.
            dimension_semantics=("parallel",),
            vmem_limit_bytes=vmem_limit,
        ),
    )(x, tgt2d)

    return jnp.sum(partials) / jnp.float32(N)


def label_smoothing_ref(x, target, smoothing=0.1):
    """Pure-JAX reference matching the PyTorch module."""
    confidence = 1.0 - smoothing
    logprobs = jax.nn.log_softmax(x.astype(jnp.float32), axis=-1)
    nll = -jnp.take_along_axis(logprobs, target[:, None], axis=-1)[:, 0]
    smooth = -jnp.mean(logprobs, axis=-1)
    return jnp.mean(confidence * nll + smoothing * smooth)


if __name__ == "__main__":
    smoothing = 0.1
    kx, kt, kx2, kt2 = jax.random.split(jax.random.PRNGKey(0), 4)

    # Test 1: f32, divisible N, single auto-sized tile.
    N, C = 16, 128
    x = jax.random.normal(kx, (N, C), dtype=jnp.float32)
    target = jax.random.randint(kt, (N,), 0, C, dtype=jnp.int32)
    loss = jax.block_until_ready(label_smoothing_loss(x, target, smoothing=smoothing))
    ref = label_smoothing_ref(x, target, smoothing=smoothing)
    assert jnp.allclose(loss, ref, atol=1e-5, rtol=1e-5), (loss, ref)

    # Test 2: bf16 on the wire, ragged N (no host padding), multiple tiles.
    N2, C2 = 40, 128
    x2 = jax.random.normal(kx2, (N2, C2), dtype=jnp.bfloat16)
    t2 = jax.random.randint(kt2, (N2,), 0, C2, dtype=jnp.int32)
    loss2 = jax.block_until_ready(
        label_smoothing_loss(x2, t2, smoothing=smoothing, row_tile=16))
    ref2 = label_smoothing_ref(x2, t2, smoothing=smoothing)
    assert jnp.allclose(loss2, ref2, atol=2e-3, rtol=2e-3), (loss2, ref2)

    print("KERNEL_OK")
</pallas_src>

<mosaic_0001>
module attributes {stable_mosaic.version = 11 : i64} {
  func.func @_label_smoothing_kernel(%arg0: i32, %arg1: memref<16x128xf32, #tpu.memory_space<vmem>>, %arg2: memref<16x1xi32, #tpu.memory_space<vmem>>, %arg3: memref<1x1xf32, #tpu.memory_space<smem>>) attributes {dimension_semantics = [#tpu.dimension_semantics<parallel>], iteration_bounds = array<i64: 1>, scalar_prefetch = 0 : i64, scratch_operands = 0 : i64, tpu.core_type = #tpu.core_type<tc>, window_params = [{transform_indices = @transform_0, window_bounds = array<i64: 16, 128>}, {transform_indices = @transform_1, window_bounds = array<i64: 16, 1>}, {transform_indices = @transform_2, window_bounds = array<i64: 1, 1>}]} {
    %c0 = arith.constant 0 : index
    %c0_0 = arith.constant 0 : index
    %0 = vector.load %arg1[%c0, %c0_0] : memref<16x128xf32, #tpu.memory_space<vmem>>, vector<16x128xf32>
    %cst = arith.constant dense<0xFF800000> : vector<16xf32>
    %1 = vector.multi_reduction <maximumf>, %0, %cst [1] : vector<16x128xf32> to vector<16xf32>
    %2 = vector.shape_cast %1 : vector<16xf32> to vector<16x1xf32>
    %3 = vector.broadcast %2 : vector<16x1xf32> to vector<16x128xf32>
    %4 = arith.subf %0, %3 : vector<16x128xf32>
    %5 = math.exp %4 : vector<16x128xf32>
    %cst_1 = arith.constant dense<0.000000e+00> : vector<16xf32>
    %6 = vector.multi_reduction <add>, %5, %cst_1 [1] : vector<16x128xf32> to vector<16xf32>
    %7 = vector.shape_cast %6 : vector<16xf32> to vector<16x1xf32>
    %8 = tpu.iota {dimensions = array<i32: 1>} : vector<16x128xi32>
    %c0_2 = arith.constant 0 : index
    %c0_3 = arith.constant 0 : index
    %9 = vector.load %arg2[%c0_2, %c0_3] : memref<16x1xi32, #tpu.memory_space<vmem>>, vector<16x1xi32>
    %10 = vector.broadcast %9 : vector<16x1xi32> to vector<16x128xi32>
    %11 = arith.cmpi eq, %8, %10 : vector<16x128xi32>
    %cst_4 = arith.constant 0.900781273 : f32
    %cst_5 = arith.constant 7.812500e-04 : f32
    %12 = vector.broadcast %cst_4 : f32 to vector<16x128xf32>
    %13 = vector.broadcast %cst_5 : f32 to vector<16x128xf32>
    %14 = arith.select %11, %12, %13 : vector<16x128xi1>, vector<16x128xf32>
    %15 = arith.mulf %14, %4 : vector<16x128xf32>
    %cst_6 = arith.constant dense<0.000000e+00> : vector<16xf32>
    %16 = vector.multi_reduction <add>, %15, %cst_6 [1] : vector<16x128xf32> to vector<16xf32>
    %17 = vector.shape_cast %16 : vector<16xf32> to vector<16x1xf32>
    %18 = math.log %7 : vector<16x1xf32>
    %19 = arith.subf %18, %17 : vector<16x1xf32>
    %20 = vector.shape_cast %19 : vector<16x1xf32> to vector<1x16x1xf32>
    %cst_7 = arith.constant dense<0.000000e+00> : vector<1xf32>
    %21 = vector.multi_reduction <add>, %20, %cst_7 [1, 2] : vector<1x16x1xf32> to vector<1xf32>
    %22 = vector.shape_cast %21 : vector<1xf32> to vector<1x1x1xf32>
    %23 = vector.extract %22[0, 0, 0] : f32 from vector<1x1x1xf32>
    %c0_8 = arith.constant 0 : index
    %c0_9 = arith.constant 0 : index
    %24 = memref.load %arg3[%c0_8, %c0_9] : memref<1x1xf32, #tpu.memory_space<smem>>
    memref.store %23, %arg3[%c0_8, %c0_9] : memref<1x1xf32, #tpu.memory_space<smem>>
    return
  }
  func.func @transform_0(%arg0: i32) -> (i32, i32) {
    %c0_i32 = arith.constant 0 : i32
    %c0_i32_0 = arith.constant 0 : i32
    return %arg0, %c0_i32 : i32, i32
  }
  func.func @transform_1(%arg0: i32) -> (i32, i32) {
    %c0_i32 = arith.constant 0 : i32
    %c0_i32_0 = arith.constant 0 : i32
    return %arg0, %c0_i32 : i32, i32
  }
  func.func @transform_2(%arg0: i32) -> (i32, i32) {
    %c0_i32 = arith.constant 0 : i32
    %c0_i32_0 = arith.constant 0 : i32
    return %arg0, %c0_i32 : i32, i32
  }
}

</mosaic_0001>

<bundles_post_ra>
// kernel: tpu_custom_call.1
= control target key start
LH: loop header
LB: loop body
LE: loop exit
PB: predicated region body
PF: predicated region fallthrough
CT: control target
= control target key end

     0   :  { %v109_v2 = vmov 0   ;;  %s151_s0 = inlined_call_operand.vmem [shape: f32[16,128], index: 0, kind: input, shape index: {}]   ;;  %s152_s1 = inlined_call_operand.vmem [shape: s32[16,1], index: 1, kind: input, shape index: {}]   ;;  %s153_s2 = inlined_call_operand.hbm [shape: f32[1,1], index: 2, kind: output, shape index: {}]  }
   0x1   :  { %v12_v0 = vld [vmem:[%s151_s0] sm:$0xff]  ;;  %87 = vset.pattern.permute.xlu1 %v109_v2 }
   0x2   :  { %v30_v1 = vld [vmem:[%s152_s1] sm:$0xff]  ;;  %14 = vmax.xlane.f32.xlu0 %v12_v0 }
   0x3   :  { %7 = vsyncpa [#allocation3], 0  ;;  %v13_v3 = vld [vmem:[%s151_s0 + $0x8] sm:$0xff]  ;;  %33 = vperm.xlu1 %87, %v30_v1   ;;  %88 = vset.pattern.permute.xlu0 %v109_v2  ;;  %v28_v8 = vlaneseq  ;;  %v110_v16 = vmov 0.00078125   ;;  %vm54_vm2 = vcmask 7168  }
   0x4   :  { %v31_v4 = vld [vmem:[%s152_s1 + $0x8] sm:$0xff]  ;;  %s97_s18 = scalar_lea.hbm %s153_s2, 16 }
   0x5   :  { %v29_v13 = vand.u32 127, %v28_v8  ;;  %p98_p0 = scmp.ne.s32.totalorder %s153_s2, %s97_s18  ;;  %p101_p1 = scmp.lt.u32.totalorder %s97_s18, %s153_s2 }
   0x6   :  { %16 = vmax.xlane.f32.xlu0 %v13_v3 }
   0x7   :  { %36 = vperm.xlu1 %87, %v31_v4   ;;  %p103_p2 = pnand %p101_p1, %p98_p0 }
  0x82   :  { %v34_v11 = vpop.permute.xlu1 %33 }
  0x83   :  { %vm38_vm0 = vcmp.eq.s32.totalorder %v29_v13, %v34_v11 }
  0x84   :  { %v40_v17 = vsel %vm38_vm0, 0.9007813, %v110_v16 }
  0x86   :  { %v37_v14 = vpop.permute.xlu1 %36 }
  0x87   :  { %vm39_vm1 = vcmp.eq.s32.totalorder %v29_v13, %v37_v14 }
  0x88   :  { %v41_v20 = vsel %vm39_vm1, 0.9007813, %v110_v16 }
  0x8f   :  { %v15_v5 = vpop.xlane.xlu0 %14 }
  0x90   :  { %v18_v6 = vsub.f32 %v12_v0, %v15_v5 }
  0x92   :  { %v20_v7 = vmul.f32 1.442695, %v18_v6  ;;  %v42_v18 = vmul.f32 %v40_v17, %v18_v6 }
  0x93   :  { %v17_v9 = vpop.xlane.xlu0 %16 }
  0x94   :  { %89 = vpow2.f32 %v20_v7  ;;  %v19_v10 = vsub.f32 %v13_v3, %v17_v9 }
  0x96   :  { %v22_v12 = vmul.f32 1.442695, %v19_v10  ;;  %v43_v21 = vmul.f32 %v41_v20, %v19_v10 }
  0x98   :  { %91 = vpow2.f32 %v22_v12 }
  0x9e   :  { %v90_v15 = vpop.eup %89 }
  0x9f   :  { %24 = vadd.xlane.f32.xlu0 %v90_v15 }
  0xa2   :  { %v92_v19 = vpop.eup %91 }
  0xa3   :  { %44 = vadd.xlane.f32.xlu0 %v42_v18  ;;  %26 = vadd.xlane.f32.xlu1 %v92_v19 }
  0xa7   :  { %46 = vadd.xlane.f32.xlu0 %v43_v21 }
 0x12c   :  { %v25_v22 = vpop.xlane.xlu0 %24 }
 0x12d   :  { %93 = vlog2.f32 %v25_v22 }
 0x130   :  { %v27_v23 = vpop.xlane.xlu1 %26  ;;  %v45_v25 = vpop.xlane.xlu0 %44 }
 0x131   :  { %95 = vlog2.f32 %v27_v23 }
 0x134   :  { %v47_v30 = vpop.xlane.xlu0 %46 }
 0x137   :  { %v94_v24 = vpop.eup %93 }
 0x138   :  { %v49_v26 = vmul.f32 0.6931472, %v94_v24 }
 0x13a   :  { %v52_v28 = vsub.f32 %v49_v26, %v45_v25 }
 0x13b   :  { %v96_v27 = vpop.eup %95 }
 0x13c   :  { %v51_v29 = vmul.f32 0.6931472, %v96_v27  ;;  %v55_v32 = vsel %vm54_vm2, %v52_v28, 0.0 }
 0x13e   :  { %v53_v31 = vsub.f32 %v51_v29, %v47_v30 }
 0x140   :  { %v56_v33 = vsel %vm54_vm2, %v53_v31, 0.0 }
 0x141   :  { %v57_v34 = vadd.f32 %v56_v33, %v55_v32 }
 0x143   :  { %58 = vadd.xlane.f32.xlu0 %v57_v34 }
 0x1d0   :  { %v59_v35 = vpop.xlane.xlu0 %58 }
 0x1d1   :  { %v60_v36 = vrot.slane %v59_v35, 4 }
 0x1d3   :  { %v61_v37 = vadd.f32 %v60_v36, %v59_v35 }
 0x1d5   :  { %v62_v38 = vrot.slane %v61_v37, 2 }
 0x1d7   :  { %v63_v39 = vadd.f32 %v62_v38, %v61_v37 }
 0x1d9   :  { %v64_v40 = vrot.slane %v63_v39, 1 }
 0x1db   :  { %v65_v41 = vadd.f32 %v64_v40, %v63_v39 }
 0x1dd   :  { %82 = vpush %v65_v41 }
 0x20e   :  { %s83_s0 = spop %82 }
 0x20f   :  { %68 = sst [smem:[#allocation2]] %s83_s0 }
 0x210   :  { %106 = shalt.err (!%p103_p2)
}
 0x211   :  { %s111_s23 = smov [#allocation2]  }
 0x212   :  { %76 = dma.smem_to_hbm %s111_s23, 16, %s153_s2, [#allocation3]  }
 0x213   :  { %107 = dma.done.wait [#allocation3], 16  }
 0x214   :  { %108 = vsyncadd [#allocation3], 4294967280 }
 0x215   :  { %80 = sfence }
 0x216   :  { %81 = vsyncpa [#allocation3], 1 }

</bundles_post_ra>
